<compile_context>
chip_gen: v5e
topology: v5e:2x2
jax: 0.10.0
libtpu: 0.0.40
codegen_flags: <defaults>
</compile_context>

<pallas_src>
import jax
import jax.numpy as jnp
from jax.experimental import pallas as pl
from jax.experimental.pallas import tpu as pltpu


def fuse_class_embedding_params(emb_table, weight, bias, out_dtype=jnp.float32):
    """Fold cond_mlp into the embedding table (done once; weights are static).

    emb_table: (C, D_in) f32    [nn.Embedding.weight]
    weight:    (D_out, D_in) f32 [nn.Linear.weight, PyTorch (out, in) layout]
    bias:      (D_out,) f32
    returns:   (C, D_out)       such that fused[y] == Linear(Embedding(y))
    """
    fused = jax.lax.dot_general(
        emb_table, weight,
        dimension_numbers=(((1,), (1,)), ((), ())),   # emb @ W^T without transposing W
        preferred_element_type=jnp.float32,
        precision=jax.lax.Precision.HIGHEST,
    ) + bias[None, :]
    return fused.astype(out_dtype)


# ---------------------------------------------------------------------------
# Small-table path: whole fused table resident in VMEM, one-hot MXU gather.
# ---------------------------------------------------------------------------
def class_embedding_onehot_kernel(y_ref, table_ref, o_ref):
    # y_ref:     (B, 1) int32 in VMEM — class indices (vector data for the compare)
    # table_ref: (C, D) f32   in VMEM — fused (Embedding @ W^T + b) table
    # o_ref:     (B, D) f32   in VMEM
    B = o_ref.shape[0]
    C = table_ref.shape[0]
    class_ids = jax.lax.broadcasted_iota(jnp.int32, (B, C), dimension=1)
    onehot = (class_ids == y_ref[...]).astype(table_ref.dtype)            # (B, C)
    # Single MXU matmul + single whole-block store (no per-row loop).
    o_ref[...] = jnp.dot(onehot, table_ref[...],
                         preferred_element_type=jnp.float32).astype(o_ref.dtype)


def _forward_small(y, fused_table):
    B = y.shape[0]
    C, D = fused_table.shape
    return pl.pallas_call(
        class_embedding_onehot_kernel,
        out_shape=jax.ShapeDtypeStruct((B, D), fused_table.dtype),
        in_specs=[
            pl.BlockSpec(memory_space=pltpu.MemorySpace.VMEM),   # indices (B,1)
            pl.BlockSpec(memory_space=pltpu.MemorySpace.VMEM),   # fused table
        ],
        out_specs=pl.BlockSpec(memory_space=pltpu.MemorySpace.VMEM),
    )(y.astype(jnp.int32).reshape(B, 1), fused_table)


# ---------------------------------------------------------------------------
# Large-table path: table stays in HBM; only the B needed rows are DMA'd,
# driven by scalar-prefetched indices (VMEM use is O(B*D), scales to v7x).
# Not exercised at the tiny demo shapes below.
# ---------------------------------------------------------------------------
def _hbm_row_gather_kernel(y_ref, row_ref, o_ref):
    # y_ref: (B,) int32 in SMEM (scalar prefetch; consumed by the index_map)
    # row_ref: (1, D) — the table row selected for this grid step
    del y_ref
    o_ref[...] = row_ref[...]


def _forward_large(y, fused_table):
    B = y.shape[0]
    C, D = fused_table.shape
    return pl.pallas_call(
        _hbm_row_gather_kernel,
        out_shape=jax.ShapeDtypeStruct((B, D), fused_table.dtype),
        grid_spec=pltpu.PrefetchScalarGridSpec(
            num_scalar_prefetch=1,
            grid=(B,),
            # Element(1): index_map returns an *element* row offset = y[i].
            in_specs=[pl.BlockSpec((pl.Element(1), D), lambda i, y: (y[i], 0))],
            out_specs=pl.BlockSpec((1, D), lambda i, y: (i, 0)),
        ),
        compiler_params=pltpu.CompilerParams(
            dimension_semantics=("parallel",),          # 2 TCs on v7x
            vmem_limit_bytes=32 * 1024 * 1024,
        ),
    )(y.astype(jnp.int32), fused_table)


_VMEM_TABLE_BYTES_LIMIT = 8 * 1024 * 1024   # headroom under v7x's 64 MiB VMEM


def class_embedding_forward(y, fused_table):
    """y: (B,) integer class ids. fused_table: (C, D). Returns (B, D)."""
    table_bytes = fused_table.size * jnp.dtype(fused_table.dtype).itemsize
    if table_bytes <= _VMEM_TABLE_BYTES_LIMIT:
        return _forward_small(y, fused_table)
    return _forward_large(y, fused_table)


if __name__ == "__main__":
    num_classes = 10
    dim = 32
    B = 8

    key = jax.random.PRNGKey(0)
    k_emb, k_w, k_b, k_y = jax.random.split(key, 4)

    # Deterministic parameter init (shapes match the PyTorch module's __init__).
    emb_table = jax.random.normal(k_emb, (num_classes, dim), dtype=jnp.float32)  # Embedding.weight
    bound = 1.0 / (dim ** 0.5)
    weight = jax.random.uniform(k_w, (dim, dim), minval=-bound, maxval=bound,
                                dtype=jnp.float32)                               # Linear.weight (out,in)
    bias = jax.random.uniform(k_b, (dim,), minval=-bound, maxval=bound,
                              dtype=jnp.float32)                                 # Linear.bias

    y = jax.random.randint(k_y, (B,), 0, num_classes, dtype=jnp.int32)

    # One-time parameter fusion (amortized across all forwards).
    fused_table = jax.block_until_ready(
        fuse_class_embedding_params(emb_table, weight, bias))

    # Per-call forward: vectorized one-hot gather inside a single Pallas kernel.
    out = class_embedding_forward(y, fused_table)
    out = jax.block_until_ready(out)

    # Pure-JAX reference with the original (unfused) semantics.
    ref = emb_table[y] @ weight.T + bias
    assert out.shape == (B, dim)
    assert jnp.allclose(out, ref, atol=1e-5, rtol=1e-5), "mismatch vs reference"

    print("KERNEL_OK")
</pallas_src>

<mosaic_0001>
module attributes {stable_mosaic.version = 11 : i64} {
  func.func @class_embedding_onehot_kernel(%arg0: memref<8x1xi32, #tpu.memory_space<vmem>>, %arg1: memref<10x32xf32, #tpu.memory_space<vmem>>, %arg2: memref<8x32xf32, #tpu.memory_space<vmem>>) attributes {dimension_semantics = [], scalar_prefetch = 0 : i64, scratch_operands = 0 : i64, tpu.core_type = #tpu.core_type<tc>} {
    %0 = tpu.iota {dimensions = array<i32: 1>} : vector<8x10xi32>
    %c0 = arith.constant 0 : index
    %c0_0 = arith.constant 0 : index
    %1 = vector.load %arg0[%c0, %c0_0] : memref<8x1xi32, #tpu.memory_space<vmem>>, vector<8x1xi32>
    %2 = vector.broadcast %1 : vector<8x1xi32> to vector<8x10xi32>
    %3 = arith.cmpi eq, %0, %2 : vector<8x10xi32>
    %4 = arith.extui %3 : vector<8x10xi1> to vector<8x10xi32>
    %5 = arith.sitofp %4 : vector<8x10xi32> to vector<8x10xf32>
    %c0_1 = arith.constant 0 : index
    %c0_2 = arith.constant 0 : index
    %6 = vector.load %arg1[%c0_1, %c0_2] : memref<10x32xf32, #tpu.memory_space<vmem>>, vector<10x32xf32>
    %cst = arith.constant dense<0.000000e+00> : vector<8x32xf32>
    %7 = tpu.matmul %5, %6, %cst {dimension_numbers = #tpu.dot_dimension_numbers<[1], [0], [0], [1], [0, 0, 1, 1], [], []>} : vector<8x10xf32>, vector<10x32xf32>, vector<8x32xf32> -> vector<8x32xf32>
    %c0_3 = arith.constant 0 : index
    %c0_4 = arith.constant 0 : index
    %8 = vector.load %arg2[%c0_3, %c0_4] : memref<8x32xf32, #tpu.memory_space<vmem>>, vector<8x32xf32>
    tpu.vector_store %arg2[%c0_3, %c0_4], %7 {strides = array<i32>} : memref<8x32xf32, #tpu.memory_space<vmem>>, vector<8x32xf32>,
    return
  }
}

</mosaic_0001>

<bundles_post_ra>
// kernel: tpu_custom_call.1
= control target key start
LH: loop header
LB: loop body
LE: loop exit
PB: predicated region body
PF: predicated region fallthrough
CT: control target
= control target key end

     0   :  { %7 = vsyncpa [#allocation3], 0  ;;  %s178_s0 = inlined_call_operand.vmem [shape: s32[8,1], index: 0, kind: input, shape index: {}]   ;;  %s179_s1 = inlined_call_operand.hbm [shape: f32[10,32], index: 1, kind: input, shape index: {}]   ;;  %s180_s2 = inlined_call_operand.hbm [shape: f32[8,32], index: 2, kind: output, shape index: {}]  }
   0x1   :  { %8 = vsyncpa [#allocation4], 0  ;;  %s15_s11 = sshll.u32 %s179_s1, 4  ;;  %s148_s12 = smov [#allocation2]   ;;  %s16_s11 = int_to_ptr.hbm [resolvable:$true] %s15_s11 }
   0x2   :  { %s17_s13 = sshll.u32 %s148_s12, 4  ;;  %s149_s14 = smov 128   ;;  %s18_s13 = int_to_ptr.vmem [resolvable:$true] %s17_s13 }
   0x3   :  { %s150_s15 = smov 8  }
   0x4   :  { %23 = dma.hbm_to_vmem [thread:$0]  %s16_s11, 256, %s18_s13, [#allocation3], %s149_s14, %s149_s14, %s150_s15  }
   0x5   :  { %144 = dma.done.wait [#allocation3], 256  }
   0x6   :  { %145 = vsyncadd [#allocation3], 4294967040  ;;  %v151_v0 = vmov 0   ;;  %vm43_vm0 = vcmask 1041408   ;;  %v30_v1 = vld [vmem:[%s178_s0] sm:$0xff]  ;;  %v28_v4 = vlaneseq  ;;  %vm39_vm1 = vcmask 80896  }
   0x7   :  { %95 = vset.pattern.permute.xlu0 %v151_v0  ;;  %v38_v2 = vld [vmem:[#allocation2 + $0x8] sm:$0x3]  ;;  %v37_v3 = vld [vmem:[#allocation2] sm:$0xff]  ;;  %v152_v7 = vmov 0.0   ;;  %s153_s1 = smov [#allocation5]   ;;  %s76_s21 = sshll.u32 %s180_s2, 4  ;;  %s77_s21 = int_to_ptr.hbm [resolvable:$true] %s76_s21 }
   0x8   :  { %32 = vperm.xlu0 %95, %v30_v1   ;;  %87 = vmatpush.msk.msra.mxu0 %vm43_vm0, %v38_v2  ;;  %v29_v5 = vand.u32 127, %v28_v4  ;;  %s74_s18 = sshll.u32 %s153_s1, 4  ;;  %vm67_vm3 = vcmask 261120   ;;  %s75_s18 = int_to_ptr.vmem [resolvable:$true] %s74_s18 }
   0xa   :  { %62 = vmatpush.msra.mxu0 %v37_v3 }
  0x7a   :  { %v33_v6 = vpop.permute.xlu0 %32 }
  0x7b   :  { %vm34_vm2 = vcmp.eq.s32.totalorder %v29_v5, %v33_v6 }
  0x7c   :  { %v86_v8 = vsel %vm34_vm2, 1.0, %v152_v7 }
  0x7d   :  { %88 = vmatmul.msk.f32.vlgmr.msra.gmra.mxu0 %vm39_vm1, %v86_v8 }
  0xfa   :  { %v64_v9 = vpop.f32.mrf.mxu0 }
  0xfb   :  { %68 = vst.msk [vmem:[#allocation5] sm:$0xff] %vm67_vm3, %v64_v9 }
  0xfc   :  { %79 = dma.vmem_to_hbm [thread:$0]  %s75_s18, 128, %s77_s21, [#allocation4]  }
  0xfd   :  { %146 = dma.done.wait [#allocation4], 128  }
  0xfe   :  { %147 = vsyncadd [#allocation4], 4294967168 }
  0xff   :  { %84 = vsyncpa [#allocation3], 1 }
 0x100   :  { %85 = vsyncpa [#allocation4], 1 }

</bundles_post_ra>
